<compile_context>
chip_gen: v7x
topology: tpu7x:2x2x1
jax: 0.10.0
libtpu: 0.0.40
codegen_flags: <defaults>
</compile_context>

<pallas_src>
import functools

import jax
import jax.numpy as jnp
from jax import lax
from jax.experimental import pallas as pl
from jax.experimental.pallas import tpu as pltpu

LANE = 128
SUBLANE = 8


def _round_up(n, m):
    return (n + m - 1) // m * m


# --------------------------------------------------------------------------
# Kernels
# --------------------------------------------------------------------------
def passcell_step_kernel(x_ref, o_ref, h_ref, wx_ref, wh_ref, b_ref,
                         o_out_ref, h_out_ref):
    """One PASS-cell update (exact match of PASScell_1.forward)."""
    hp = o_ref.shape[1]
    in_len = x_ref.shape[1]

    # h-side: single (B, Hp) @ (Hp, 4*Hp) MXU pass + fused bias.
    pre = jnp.dot(h_ref[...], wh_ref[...],
                  preferred_element_type=jnp.float32) + b_ref[...]

    # x-side: K = input_length is tiny -> VPU broadcast FMAs instead of a
    # heavily padded MXU pass.
    x = x_ref[...]
    wx = wx_ref[...]
    for j in range(in_len):
        pre = pre + x[:, j:j + 1] * wx[j:j + 1, :]

    gates = jax.nn.sigmoid(pre)                  # one EUP pass over (B, 4*Hp)
    f = gates[:, 0 * hp:1 * hp]
    i = gates[:, 1 * hp:2 * hp]
    k = gates[:, 2 * hp:3 * hp]
    g = gates[:, 3 * hp:4 * hp]

    o_new = f * o_ref[...] - i * g               # relu(g) == g (sigmoid > 0)
    h_new = k * jnp.maximum(o_new, 0.0)
    o_out_ref[...] = o_new.astype(o_out_ref.dtype)
    h_out_ref[...] = h_new.astype(h_out_ref.dtype)


def passcell_seq_kernel(xproj_ref, o0_ref, h0_ref, wh_ref,
                        o_out_ref, h_out_ref):
    """T serial PASS-cell steps inside one kernel invocation.

    xproj_ref: (T, Bp, 4*Hp)   precomputed x @ wx_f + b_f (off critical path)
    wh_ref:    (Hp, 4*Hp)      fused recurrent weights, resident in VMEM
    """
    t_steps = xproj_ref.shape[0]
    hp = o0_ref.shape[1]

    def step(t, carry):
        o, h = carry
        pre = xproj_ref[t] + jnp.dot(h, wh_ref[...],
                                     preferred_element_type=jnp.float32)
        gates = jax.nn.sigmoid(pre)
        f = gates[:, 0 * hp:1 * hp]
        i = gates[:, 1 * hp:2 * hp]
        k = gates[:, 2 * hp:3 * hp]
        g = gates[:, 3 * hp:4 * hp]
        o_new = f * o - i * g                    # relu(g) == g (sigmoid > 0)
        h_new = k * jnp.maximum(o_new, 0.0)
        return (o_new, h_new)

    unroll = True if t_steps <= 64 else 8
    o_fin, h_fin = lax.fori_loop(0, t_steps, step,
                                 (o0_ref[...], h0_ref[...]),
                                 unroll=unroll)
    o_out_ref[...] = o_fin.astype(o_out_ref.dtype)
    h_out_ref[...] = h_fin.astype(h_out_ref.dtype)


# --------------------------------------------------------------------------
# Wrappers
# --------------------------------------------------------------------------
@functools.partial(jax.jit, static_argnames=("hidden_length",))
def passcell_forward(x, o, h, wx_f, wh_f, b_f, *, hidden_length):
    """Single-step cell (debug/verification path; matches module.forward)."""
    B, I = x.shape
    H = hidden_length
    Hp = wh_f.shape[0]
    G4 = wh_f.shape[1]
    Bp = _round_up(B, SUBLANE)

    xp = jnp.zeros((Bp, I), jnp.float32).at[:B, :].set(x)
    op = jnp.zeros((Bp, Hp), jnp.float32).at[:B, :H].set(o)
    hp = jnp.zeros((Bp, Hp), jnp.float32).at[:B, :H].set(h)

    vmem = pl.BlockSpec(memory_space=pltpu.MemorySpace.VMEM)
    o_new, h_new = pl.pallas_call(
        passcell_step_kernel,
        out_shape=(jax.ShapeDtypeStruct((Bp, Hp), jnp.float32),
                   jax.ShapeDtypeStruct((Bp, Hp), jnp.float32)),
        in_specs=[vmem] * 6,
        out_specs=(vmem, vmem),
    )(xp, op, hp, wx_f, wh_f, b_f)
    del G4
    return o_new[:B, :H], h_new[:B, :H]


@functools.partial(jax.jit, static_argnames=("hidden_length",))
def passcell_sequence(x_seq, o0, h0, wx_f, wh_f, b_f, *, hidden_length):
    """Apply the cell over a (T, B, I) sequence in ONE pallas_call."""
    T, B, I = x_seq.shape
    H = hidden_length
    Hp = wh_f.shape[0]
    G4 = wh_f.shape[1]
    Bp = _round_up(B, SUBLANE)

    # Hoist the x-side projection + bias out of the serial recurrence:
    # one (T*B, I) @ (I, 4*Hp) matmul, done once, off the critical path.
    xproj = (jnp.dot(x_seq.reshape(T * B, I), wx_f,
                     preferred_element_type=jnp.float32)
             + b_f).reshape(T, B, G4)
    xproj_p = jnp.zeros((T, Bp, G4), jnp.float32).at[:, :B, :].set(xproj)
    o0p = jnp.zeros((Bp, Hp), jnp.float32).at[:B, :H].set(o0)
    h0p = jnp.zeros((Bp, Hp), jnp.float32).at[:B, :H].set(h0)

    vmem = pl.BlockSpec(memory_space=pltpu.MemorySpace.VMEM)
    o_fin, h_fin = pl.pallas_call(
        passcell_seq_kernel,
        out_shape=(jax.ShapeDtypeStruct((Bp, Hp), jnp.float32),
                   jax.ShapeDtypeStruct((Bp, Hp), jnp.float32)),
        in_specs=[vmem] * 4,
        out_specs=(vmem, vmem),
    )(xproj_p, o0p, h0p, wh_f)
    return o_fin[:B, :H], h_fin[:B, :H]
    # TODO(synk): for large H, store wh_f in bfloat16 and tile the 4*Hp output
    # dim across a grid axis to stay within v7x's 64 MiB VMEM.


# --------------------------------------------------------------------------
# Parameters: PyTorch-style per-gate init, then fused + lane-padded layout.
# --------------------------------------------------------------------------
def init_params(key, input_length, hidden_length):
    """Deterministic init mimicking nn.Linear (uniform +-1/sqrt(fan_in))."""
    kx_w, kx_b, kh_w = jax.random.split(key, 3)
    bx = 1.0 / jnp.sqrt(jnp.float32(input_length))
    bh = 1.0 / jnp.sqrt(jnp.float32(hidden_length))
    # stored pre-transposed per gate: (in, out); gate order [f, i, k, g]
    wx = jax.random.uniform(kx_w, (4, input_length, hidden_length),
                            jnp.float32, -bx, bx)
    b = jax.random.uniform(kx_b, (4, hidden_length), jnp.float32, -bx, bx)
    wh = jax.random.uniform(kh_w, (4, hidden_length, hidden_length),
                            jnp.float32, -bh, bh)
    return wx, wh, b


def fuse_and_pad_params(wx, wh, b, lane=LANE):
    """Concatenate the four gates on the lane axis, zero-padded to 128-lane
    gate boundaries so every gate slice in the kernel is vreg-aligned."""
    _, I, H = wx.shape
    Hp = _round_up(H, lane)
    wx_p = jnp.zeros((4, I, Hp), jnp.float32).at[:, :, :H].set(wx)
    wh_p = jnp.zeros((4, Hp, Hp), jnp.float32).at[:, :H, :H].set(wh)
    b_p = jnp.zeros((4, Hp), jnp.float32).at[:, :H].set(b)
    wx_f = jnp.transpose(wx_p, (1, 0, 2)).reshape(I, 4 * Hp)   # (I, 4*Hp)
    wh_f = jnp.transpose(wh_p, (1, 0, 2)).reshape(Hp, 4 * Hp)  # (Hp, 4*Hp)
    b_f = b_p.reshape(1, 4 * Hp)                               # (1, 4*Hp)
    return wx_f, wh_f, b_f


def passcell_reference(x, o, h, wx, wh, b):
    """Pure-JAX mirror of the PyTorch forward (per-gate), for verification."""
    def gate(idx):
        return jax.nn.sigmoid(x @ wx[idx] + h @ wh[idx] + b[idx])
    f, i, k, g = gate(0), gate(1), gate(2), gate(3)
    o_new = f * o - i * jax.nn.relu(g)
    h_new = k * jax.nn.relu(o_new)
    return o_new, h_new


if __name__ == "__main__":
    input_length = 3
    hidden_length = 20
    batch = 8
    seq_len = 16

    key = jax.random.PRNGKey(0)
    k_param, k_x, k_o, k_h, k_xs = jax.random.split(key, 5)

    wx, wh, b = init_params(k_param, input_length, hidden_length)
    wx_f, wh_f, b_f = fuse_and_pad_params(wx, wh, b)

    x = jax.random.normal(k_x, (batch, input_length), jnp.float32)
    o0 = jax.random.normal(k_o, (batch, hidden_length), jnp.float32)
    h0 = jax.random.normal(k_h, (batch, hidden_length), jnp.float32)
    x_seq = jax.random.normal(k_xs, (seq_len, batch, input_length),
                              jnp.float32)

    # Pure-JAX references (mirror the PyTorch forward).
    o_ref1, h_ref1 = passcell_reference(x, o0, h0, wx, wh, b)
    o_rs, h_rs = o0, h0
    for t in range(seq_len):
        o_rs, h_rs = passcell_reference(x_seq[t], o_rs, h_rs, wx, wh, b)

    # Single-step fused kernel (exact module.forward).
    o1, h1 = jax.block_until_ready(
        passcell_forward(x, o0, h0, wx_f, wh_f, b_f,
                         hidden_length=hidden_length))

    # Whole-sequence kernel: T serial steps inside ONE pallas_call.
    o_s, h_s = jax.block_until_ready(
        passcell_sequence(x_seq, o0, h0, wx_f, wh_f, b_f,
                          hidden_length=hidden_length))

    assert jnp.allclose(o1, o_ref1, atol=1e-5, rtol=1e-5)
    assert jnp.allclose(h1, h_ref1, atol=1e-5, rtol=1e-5)
    assert jnp.allclose(o_s, o_rs, atol=1e-4, rtol=1e-4)
    assert jnp.allclose(h_s, h_rs, atol=1e-4, rtol=1e-4)

    print("KERNEL_OK")
</pallas_src>

<mosaic_0001>
module attributes {stable_mosaic.version = 11 : i64} {
  func.func @passcell_step_kernel(%arg0: memref<8x3xf32, #tpu.memory_space<vmem>>, %arg1: memref<8x128xf32, #tpu.memory_space<vmem>>, %arg2: memref<8x128xf32, #tpu.memory_space<vmem>>, %arg3: memref<3x512xf32, #tpu.memory_space<vmem>>, %arg4: memref<128x512xf32, #tpu.memory_space<vmem>>, %arg5: memref<1x512xf32, #tpu.memory_space<vmem>>, %arg6: memref<8x128xf32, #tpu.memory_space<vmem>>, %arg7: memref<8x128xf32, #tpu.memory_space<vmem>>) attributes {dimension_semantics = [], scalar_prefetch = 0 : i64, scratch_operands = 0 : i64, tpu.core_type = #tpu.core_type<tc>} {
    %c0 = arith.constant 0 : index
    %c0_0 = arith.constant 0 : index
    %0 = vector.load %arg2[%c0, %c0_0] : memref<8x128xf32, #tpu.memory_space<vmem>>, vector<8x128xf32>
    %c0_1 = arith.constant 0 : index
    %c0_2 = arith.constant 0 : index
    %1 = vector.load %arg4[%c0_1, %c0_2] : memref<128x512xf32, #tpu.memory_space<vmem>>, vector<128x512xf32>
    %cst = arith.constant dense<0.000000e+00> : vector<8x512xf32>
    %2 = tpu.matmul %0, %1, %cst {dimension_numbers = #tpu.dot_dimension_numbers<[1], [0], [0], [1], [0, 0, 1, 1], [], []>} : vector<8x128xf32>, vector<128x512xf32>, vector<8x512xf32> -> vector<8x512xf32>
    %c0_3 = arith.constant 0 : index
    %c0_4 = arith.constant 0 : index
    %3 = vector.load %arg5[%c0_3, %c0_4] : memref<1x512xf32, #tpu.memory_space<vmem>>, vector<1x512xf32>
    %4 = vector.broadcast %3 : vector<1x512xf32> to vector<8x512xf32>
    %5 = arith.addf %2, %4 : vector<8x512xf32>
    %c0_5 = arith.constant 0 : index
    %c0_6 = arith.constant 0 : index
    %6 = vector.load %arg0[%c0_5, %c0_6] : memref<8x3xf32, #tpu.memory_space<vmem>>, vector<8x3xf32>
    %c0_7 = arith.constant 0 : index
    %c0_8 = arith.constant 0 : index
    %7 = vector.load %arg3[%c0_7, %c0_8] : memref<3x512xf32, #tpu.memory_space<vmem>>, vector<3x512xf32>
    %8 = vector.extract_strided_slice %6 {offsets = [0, 0], sizes = [8, 1], strides = [1, 1]} : vector<8x3xf32> to vector<8x1xf32>
    %9 = vector.extract_strided_slice %7 {offsets = [0, 0], sizes = [1, 512], strides = [1, 1]} : vector<3x512xf32> to vector<1x512xf32>
    %10 = vector.broadcast %8 : vector<8x1xf32> to vector<8x512xf32>
    %11 = vector.broadcast %9 : vector<1x512xf32> to vector<8x512xf32>
    %12 = arith.mulf %10, %11 : vector<8x512xf32>
    %13 = arith.addf %5, %12 : vector<8x512xf32>
    %14 = vector.extract_strided_slice %6 {offsets = [0, 1], sizes = [8, 1], strides = [1, 1]} : vector<8x3xf32> to vector<8x1xf32>
    %15 = vector.extract_strided_slice %7 {offsets = [1, 0], sizes = [1, 512], strides = [1, 1]} : vector<3x512xf32> to vector<1x512xf32>
    %16 = vector.broadcast %14 : vector<8x1xf32> to vector<8x512xf32>
    %17 = vector.broadcast %15 : vector<1x512xf32> to vector<8x512xf32>
    %18 = arith.mulf %16, %17 : vector<8x512xf32>
    %19 = arith.addf %13, %18 : vector<8x512xf32>
    %20 = vector.extract_strided_slice %6 {offsets = [0, 2], sizes = [8, 1], strides = [1, 1]} : vector<8x3xf32> to vector<8x1xf32>
    %21 = vector.extract_strided_slice %7 {offsets = [2, 0], sizes = [1, 512], strides = [1, 1]} : vector<3x512xf32> to vector<1x512xf32>
    %22 = vector.broadcast %20 : vector<8x1xf32> to vector<8x512xf32>
    %23 = vector.broadcast %21 : vector<1x512xf32> to vector<8x512xf32>
    %24 = arith.mulf %22, %23 : vector<8x512xf32>
    %25 = arith.addf %19, %24 : vector<8x512xf32>
    %26 = arith.negf %25 : vector<8x512xf32>
    %27 = math.exp %26 : vector<8x512xf32>
    %cst_9 = arith.constant 1.000000e+00 : f32
    %28 = vector.broadcast %cst_9 : f32 to vector<8x512xf32>
    %29 = arith.addf %28, %27 : vector<8x512xf32>
    %30 = arith.divf %28, %29 : vector<8x512xf32>
    %31 = vector.extract_strided_slice %30 {offsets = [0, 0], sizes = [8, 128], strides = [1, 1]} : vector<8x512xf32> to vector<8x128xf32>
    %32 = vector.extract_strided_slice %30 {offsets = [0, 128], sizes = [8, 128], strides = [1, 1]} : vector<8x512xf32> to vector<8x128xf32>
    %33 = vector.extract_strided_slice %30 {offsets = [0, 256], sizes = [8, 128], strides = [1, 1]} : vector<8x512xf32> to vector<8x128xf32>
    %34 = vector.extract_strided_slice %30 {offsets = [0, 384], sizes = [8, 128], strides = [1, 1]} : vector<8x512xf32> to vector<8x128xf32>
    %c0_10 = arith.constant 0 : index
    %c0_11 = arith.constant 0 : index
    %35 = vector.load %arg1[%c0_10, %c0_11] : memref<8x128xf32, #tpu.memory_space<vmem>>, vector<8x128xf32>
    %36 = arith.mulf %31, %35 : vector<8x128xf32>
    %37 = arith.mulf %32, %34 : vector<8x128xf32>
    %38 = arith.subf %36, %37 : vector<8x128xf32>
    %cst_12 = arith.constant 0.000000e+00 : f32
    %39 = vector.broadcast %cst_12 : f32 to vector<8x128xf32>
    %40 = arith.maximumf %38, %39 : vector<8x128xf32>
    %41 = arith.mulf %33, %40 : vector<8x128xf32>
    %c0_13 = arith.constant 0 : index
    %c0_14 = arith.constant 0 : index
    %42 = vector.load %arg6[%c0_13, %c0_14] : memref<8x128xf32, #tpu.memory_space<vmem>>, vector<8x128xf32>
    tpu.vector_store %arg6[%c0_13, %c0_14], %38 {strides = array<i32>} : memref<8x128xf32, #tpu.memory_space<vmem>>, vector<8x128xf32>,
    %c0_15 = arith.constant 0 : index
    %c0_16 = arith.constant 0 : index
    %43 = vector.load %arg7[%c0_15, %c0_16] : memref<8x128xf32, #tpu.memory_space<vmem>>, vector<8x128xf32>
    tpu.vector_store %arg7[%c0_15, %c0_16], %41 {strides = array<i32>} : memref<8x128xf32, #tpu.memory_space<vmem>>, vector<8x128xf32>,
    return
  }
}

</mosaic_0001>

<bundles_post_ra>
// kernel: passcell_forward.1
= control target key start
LH: loop header
LB: loop body
LE: loop exit
PB: predicated region body
PF: predicated region fallthrough
CT: control target
= control target key end

     0   :  { %13 = vsyncpa [#allocation3], 0  ;;  %s755_s0 = inlined_call_operand.vmem [shape: f32[8,3], index: 0, kind: input, shape index: {}]   ;;  %s756_s1 = inlined_call_operand.vmem [shape: f32[8,128], index: 1, kind: input, shape index: {}]   ;;  %s757_s2 = inlined_call_operand.vmem [shape: f32[8,128], index: 2, kind: input, shape index: {}]   ;;  %s758_s3 = inlined_call_operand.vmem [shape: f32[3,512], index: 3, kind: input, shape index: {}]   ;;  %s759_s4 = inlined_call_operand.hbm [shape: f32[128,512], index: 4, kind: input, shape index: {}]   ;;  %s760_s5 = inlined_call_operand.vmem [shape: f32[1,512], index: 5, kind: input, shape index: {}]   ;;  %s761_s6 = inlined_call_operand.hbm [shape: f32[8,128], index: 6, kind: output, shape index: {0}]   ;;  %s762_s7 = inlined_call_operand.hbm [shape: f32[8,128], index: 7, kind: output, shape index: {1}]  }
   0x1   :  { %14 = vsyncpa [#allocation4], 0 }
   0x2   :  { %15 = vsyncpa [#allocation7], 0  ;;  %s650_s24 = smov [#allocation2]   ;;  %s578_s28 = scalar_lea.hbm %s759_s4, 8192 }
   0x3   :  { %s29_s25 = sshll.u32 %s650_s24, 4  ;;  %p579_p0 = scmp.ne.s32.totalorder %s759_s4, %s578_s28  ;;  %s30_s25 = int_to_ptr.vmem [resolvable:$true] %s29_s25 }
   0x4   :  { %p582_p1 = scmp.lt.u32.totalorder %s578_s28, %s759_s4 }
   0x6   :  { %p584_p2 = pnand %p582_p1, %p579_p0 }
   0x8   :  { %587 = shalt.err (!%p584_p2)
}
   0x9   :  { %s588_s10 = scalar_lea.vmem %s30_s25, 8192  ;;  %p593_p4 = scmp.lt.s32.totalorder %s30_s25, %s30_s25 }
   0xa   :  { %p589_p3 = scmp.ne.s32.totalorder %s30_s25, %s588_s10  ;;  %p594_p5 = scmp.lt.s32.totalorder %s588_s10, %s588_s10 }
   0xc   :  { %p595_p6 = por %p594_p5, %p593_p4 }
   0xe   :  { %p596_p7 = pnand %p595_p6, %p589_p3 }
  0x10   :  { %599 = shalt.err (!%p596_p7)
}
  0x11   :  { %s651_s11 = smov 512   ;;  %s652_s12 = smov 32  }
  0x12   :  { %35 = dma.hbm_to_vmem [thread:$0]  %s759_s4, 8192, %s30_s25, [#allocation3], %s651_s11, %s651_s11, %s652_s12  }
  0x13   :  { %644 = dma.done.wait [#allocation3], 8192  }
  0x14   :  { %645 = vsyncadd [#allocation3], 4294959104  ;;  %v653_v0 = vmov 0.0   ;;  %v654_v1 = vmov 0   ;;  %v655_v2 = vmov 2   ;;  %v43_v3 = vld [vmem:[#allocation2 + $0x8] sm:$0xff] }
  0x15   :  { %192 = vmatprep.mubr.f32.mxu0 %v653_v0  ;;  %263 = vmatprep.mubr.f32.mxu1 %v653_v0  ;;  %v47_v4 = vld [vmem:[#allocation2 + $0x28] sm:$0xff]  ;;  %v45_v5 = vld [vmem:[#allocation2 + $0x18] sm:$0xff]  ;;  %v42_v8 = vld [vmem:[#allocation2] sm:$0xff]  ;;  %s657_s22 = smov [#allocation5]   ;;  %s658_s24 = smov [#allocation6]  }
  0x16   :  { %558 = vset.pattern.permute.xlu0 %v654_v1  ;;  %560 = vset.pattern.permute.xlu1 %v655_v2  ;;  %v485_v6 = vpack.c.bf16 %v47_v4, %v43_v3  ;;  %v49_v7 = vld [vmem:[#allocation2 + $0x38] sm:$0xff]  ;;  %v46_v9 = vld [vmem:[#allocation2 + $0x20] sm:$0xff]  ;;  %v44_v12 = vld [vmem:[#allocation2 + $0x10] sm:$0xff]  ;;  %s458_s23 = sshll.u32 %s657_s22, 4  ;;  %s468_s25 = sshll.u32 %s658_s24, 4  ;;  %s459_s23 = int_to_ptr.vmem [resolvable:$true] %s458_s23  ;;  %s469_s25 = int_to_ptr.vmem [resolvable:$true] %s468_s25 }
  0x17   :  { %v517_v10 = vpack.c.bf16 %v49_v7, %v45_v5  ;;  %v487_v11 = vpack.c.bf16 %v46_v9, %v42_v8  ;;  %v48_v13 = vld [vmem:[#allocation2 + $0x30] sm:$0xff]  ;;  %v51_v14 = vld [vmem:[#allocation2 + $0x48] sm:$0xff]  ;;  %v53_v17 = vld [vmem:[#allocation2 + $0x58] sm:$0xff]  ;;  %s600_s26 = scalar_lea.vmem %s459_s23, 128  ;;  %p605_p9 = scmp.lt.s32.totalorder %s459_s23, %s459_s23 }
  0x18   :  { %486 = vmatprep.subr.bf16.mxu0 %v485_v6  ;;  %v519_v15 = vpack.c.bf16 %v48_v13, %v44_v12  ;;  %v55_v16 = vld [vmem:[#allocation2 + $0x68] sm:$0xff]  ;;  %v57_v18 = vld [vmem:[#allocation2 + $0x78] sm:$0xff]  ;;  %v50_v21 = vld [vmem:[#allocation2 + $0x40] sm:$0xff]  ;;  %p601_p8 = scmp.ne.s32.totalorder %s459_s23, %s600_s26  ;;  %p606_p10 = scmp.lt.s32.totalorder %s600_s26, %s600_s26 }
  0x19   :  { %518 = vmatprep.subr.bf16.mxu1 %v517_v10  ;;  %488 = vmatpush1.bf16.msra.mxu0 %v487_v11  ;;  %v489_v19 = vpack.c.bf16 %v55_v16, %v51_v14  ;;  %v521_v20 = vpack.c.bf16 %v57_v18, %v53_v17  ;;  %v54_v22 = vld [vmem:[#allocation2 + $0x60] sm:$0xff]  ;;  %v52_v23 = vld [vmem:[#allocation2 + $0x50] sm:$0xff]  ;;  %v59_v26 = vld [vmem:[#allocation2 + $0x88] sm:$0xff] }
  0x1a   :  { %520 = vmatpush1.bf16.msra.mxu1 %v519_v15  ;;  %v491_v24 = vpack.c.bf16 %v54_v22, %v50_v21  ;;  %v56_v25 = vld [vmem:[#allocation2 + $0x70] sm:$0xff]  ;;  %v63_v27 = vld [vmem:[#allocation2 + $0xa8] sm:$0xff]  ;;  %v61_v30 = vld [vmem:[#allocation2 + $0x98] sm:$0xff]  ;;  %p607_p11 = por %p606_p10, %p605_p9 }
  0x1b   :  { %490 = vmatprep.subr.bf16.mxu0 %v489_v19  ;;  %522 = vmatprep.subr.bf16.mxu1 %v521_v20  ;;  %v523_v28 = vpack.c.bf16 %v56_v25, %v52_v23  ;;  %v493_v29 = vpack.c.bf16 %v63_v27, %v59_v26  ;;  %v65_v31 = vld [vmem:[#allocation2 + $0xb8] sm:$0xff]  ;;  %v58_v32 = vld [vmem:[#allocation2 + $0x80] sm:$0xff]  ;;  %v60_v35 = vld [vmem:[#allocation2 + $0x90] sm:$0xff] }
  0x1c   :  { %v525_v33 = vpack.c.bf16 %v65_v31, %v61_v30  ;;  %v62_v34 = vld [vmem:[#allocation2 + $0xa0] sm:$0xff]  ;;  %v64_v36 = vld [vmem:[#allocation2 + $0xb0] sm:$0xff]  ;;  %v67_v38 = vld [vmem:[#allocation2 + $0xc8] sm:$0xff]  ;;  %p608_p12 = pnand %p607_p11, %p601_p8 }
  0x1d   :  { %492 = vmatpush1.bf16.msra.mxu0 %v491_v24  ;;  %v495_v37 = vpack.c.bf16 %v62_v34, %v58_v32  ;;  %v71_v39 = vld [vmem:[#allocation2 + $0xe8] sm:$0xff]  ;;  %v69_v40 = vld [vmem:[#allocation2 + $0xd8] sm:$0xff]  ;;  %v527_v41 = vpack.c.bf16 %v64_v36, %v60_v35  ;;  %v66_v44 = vld [vmem:[#allocation2 + $0xc0] sm:$0xff]  ;;  %v656_v35 = vmov 1  }
  0x1e   :  { %524 = vmatpush1.bf16.msra.mxu1 %v523_v28  ;;  %494 = vmatprep.subr.bf16.mxu0 %v493_v29  ;;  %v497_v42 = vpack.c.bf16 %v71_v39, %v67_v38  ;;  %v73_v43 = vld [vmem:[#allocation2 + $0xf8] sm:$0xff]  ;;  %v70_v45 = vld [vmem:[#allocation2 + $0xe0] sm:$0xff]  ;;  %v68_v47 = vld [vmem:[#allocation2 + $0xd0] sm:$0xff]  ;;  %v108_v39 = vlaneseq }
  0x1f   :  { %526 = vmatprep.subr.bf16.mxu1 %v525_v33  ;;  %v529_v46 = vpack.c.bf16 %v73_v43, %v69_v40  ;;  %v72_v48 = vld [vmem:[#allocation2 + $0xf0] sm:$0xff]  ;;  %v75_v49 = vld [vmem:[#allocation2 + $0x108] sm:$0xff]  ;;  %v77_v51 = vld [vmem:[#allocation2 + $0x118] sm:$0xff]  ;;  %v499_v53 = vpack.c.bf16 %v70_v45, %v66_v44 }
  0x20   :  { %v79_v50 = vld [vmem:[#allocation2 + $0x128] sm:$0xff]  ;;  %v81_v52 = vld [vmem:[#allocation2 + $0x138] sm:$0xff]  ;;  %v531_v54 = vpack.c.bf16 %v72_v48, %v68_v47  ;;  %v74_v56 = vld [vmem:[#allocation2 + $0x100] sm:$0xff]  ;;  %v109_v40 = vshrl.u32 %v108_v39, 7 }
  0x21   :  { %496 = vmatpush1.bf16.msra.mxu0 %v495_v37  ;;  %v501_v55 = vpack.c.bf16 %v79_v50, %v75_v49  ;;  %v78_v57 = vld [vmem:[#allocation2 + $0x120] sm:$0xff]  ;;  %v76_v58 = vld [vmem:[#allocation2 + $0x110] sm:$0xff]  ;;  %v533_v59 = vpack.c.bf16 %v81_v52, %v77_v51  ;;  %v83_v61 = vld [vmem:[#allocation2 + $0x148] sm:$0xff] }
  0x22   :  { %528 = vmatpush1.bf16.msra.mxu1 %v527_v41  ;;  %498 = vmatprep.subr.bf16.mxu0 %v497_v42  ;;  %v80_v60 = vld [vmem:[#allocation2 + $0x130] sm:$0xff]  ;;  %v87_v62 = vld [vmem:[#allocation2 + $0x168] sm:$0xff]  ;;  %v85_v63 = vld [vmem:[#allocation2 + $0x158] sm:$0xff]  ;;  %v503_v1 = vpack.c.bf16 %v78_v57, %v74_v56  ;;  %v110_v41 = vsub.s32 0, %v109_v40  ;;  %v286_v44 = vsub.s32 4, %v109_v40  ;;  %v334_v45 = vsub.s32 5, %v109_v40 }
  0x23   :  { %530 = vmatprep.subr.bf16.mxu1 %v529_v46  ;;  %v89_v0 = vld [vmem:[#allocation2 + $0x178] sm:$0xff]  ;;  %v535_v3 = vpack.c.bf16 %v80_v60, %v76_v58  ;;  %v505_v4 = vpack.c.bf16 %v87_v62, %v83_v61  ;;  %v82_v5 = vld [vmem:[#allocation2 + $0x140] sm:$0xff]  ;;  %v84_v7 = vld [vmem:[#allocation2 + $0x150] sm:$0xff]  ;;  %v382_v49 = vsub.s32 6, %v109_v40  ;;  %v118_v50 = vsub.s32 2, %v109_v40 }
  0x24   :  { %v86_v6 = vld [vmem:[#allocation2 + $0x160] sm:$0xff]  ;;  %v537_v8 = vpack.c.bf16 %v89_v0, %v85_v63  ;;  %v88_v9 = vld [vmem:[#allocation2 + $0x170] sm:$0xff]  ;;  %v91_v10 = vld [vmem:[#allocation2 + $0x188] sm:$0xff]  ;;  %v122_v57 = vsub.s32 3, %v109_v40 }
  0x25   :  { %500 = vmatpush1.bf16.msra.mxu0 %v499_v53  ;;  %v95_v11 = vld [vmem:[#allocation2 + $0x1a8] sm:$0xff]  ;;  %v93_v12 = vld [vmem:[#allocation2 + $0x198] sm:$0xff]  ;;  %v507_v14 = vpack.c.bf16 %v86_v6, %v82_v5  ;;  %v90_v15 = vld [vmem:[#allocation2 + $0x180] sm:$0xff]  ;;  %v539_v16 = vpack.c.bf16 %v88_v9, %v84_v7 }
  0x26   :  { %532 = vmatpush1.bf16.msra.mxu1 %v531_v54  ;;  %502 = vmatprep.subr.bf16.mxu0 %v501_v55  ;;  %v97_v13 = vld [vmem:[#allocation2 + $0x1b8] sm:$0xff]  ;;  %v509_v17 = vpack.c.bf16 %v95_v11, %v91_v10  ;;  %v94_v18 = vld [vmem:[#allocation2 + $0x1a0] sm:$0xff]  ;;  %v92_v19 = vld [vmem:[#allocation2 + $0x190] sm:$0xff] }
  0x27   :  { %534 = vmatprep.subr.bf16.mxu1 %v533_v59  ;;  %v270_v20 = vld [vmem:[%s755_s0] sm:$0xff]  ;;  %v541_v21 = vpack.c.bf16 %v97_v13, %v93_v12  ;;  %v96_v22 = vld [vmem:[#allocation2 + $0x1b0] sm:$0xff]  ;;  %v99_v23 = vld [vmem:[#allocation2 + $0x1c8] sm:$0xff]  ;;  %v511_v27 = vpack.c.bf16 %v94_v18, %v90_v15 }
  0x28   :  { %v103_v24 = vld [vmem:[#allocation2 + $0x1e8] sm:$0xff]  ;;  %275 = vperm.xlu0 %558, %v270_v20   ;;  %v101_v25 = vld [vmem:[#allocation2 + $0x1d8] sm:$0xff]  ;;  %373 = vperm.xlu1 %560, %v270_v20   ;;  %v543_v28 = vpack.c.bf16 %v96_v22, %v92_v19  ;;  %v98_v30 = vld [vmem:[#allocation2 + $0x1c0] sm:$0xff] }
  0x29   :  { %504 = vmatpush1.bf16.msra.mxu0 %v503_v1  ;;  %v105_v26 = vld [vmem:[#allocation2 + $0x1f8] sm:$0xff]  ;;  %v513_v29 = vpack.c.bf16 %v103_v24, %v99_v23  ;;  %v102_v31 = vld [vmem:[#allocation2 + $0x1e0] sm:$0xff]  ;;  %v100_v33 = vld [vmem:[#allocation2 + $0x1d0] sm:$0xff] }
  0x2a   :  { %536 = vmatpush1.bf16.msra.mxu1 %v535_v3  ;;  %506 = vmatprep.subr.bf16.mxu0 %v505_v4  ;;  %v545_v32 = vpack.c.bf16 %v105_v26, %v101_v25  ;;  %v104_v34 = vld [vmem:[#allocation2 + $0x1f0] sm:$0xff]  ;;  %v515_v36 = vpack.c.bf16 %v102_v31, %v98_v30  ;;  %v41_v38 = vld [vmem:[%s757_s2] sm:$0xff]  ;;  %v272_v43 = vld [vmem:[%s758_s3 + $0x8] sm:$0x77] }
  0x2b   :  { %538 = vmatprep.subr.bf16.mxu1 %v537_v8  ;;  %v547_v37 = vpack.c.bf16 %v104_v34, %v100_v33  ;;  %v271_v42 = vld [vmem:[%s758_s3] sm:$0x77]  ;;  %v291_v48 = vrot.slane %v272_v43, %v110_v41  ;;  %v295_v52 = vrot.slane %v272_v43, %v286_v44  ;;  %v343_v58 = vrot.slane %v272_v43, %v334_v45 }
  0x2c   :  { %559 = vset.pattern.permute.xlu0 %v656_v35  ;;  %v283_v47 = vrot.slane %v271_v42, %v110_v41  ;;  %v287_v51 = vrot.slane %v271_v42, %v286_v44  ;;  %v106_v54 = vld [vmem:[%s760_s5] sm:$0xf]  ;;  %v335_v55 = vrot.slane %v271_v42, %v334_v45  ;;  %v379_v59 = vrot.slane %v271_v42, %v118_v50 }
  0x2d   :  { %508 = vmatpush1.bf16.msra.mxu0 %v507_v14  ;;  %325 = vperm.xlu0 %559, %v270_v20   ;;  %v387_v60 = vrot.slane %v272_v43, %v118_v50  ;;  %v311_v62 = vrot.slane %v291_v48, %v110_v41  ;;  %v383_v63 = vrot.slane %v271_v42, %v382_v49 }
  0x2e   :  { %540 = vmatpush1.bf16.msra.mxu1 %v539_v16  ;;  %510 = vmatprep.subr.bf16.mxu0 %v509_v17  ;;  %v303_v61 = vrot.slane %v283_v47, %v110_v41  ;;  %v391_v0 = vrot.slane %v272_v43, %v382_v49  ;;  %v111_v1 = vrot.slane %v106_v54, %v110_v41 }
  0x2f   :  { %542 = vmatprep.subr.bf16.mxu1 %v541_v21  ;;  %v307_v3 = vrot.slane %v287_v51, %v110_v41  ;;  %v315_v4 = vrot.slane %v295_v52, %v110_v41  ;;  %v119_v6 = vrot.slane %v106_v54, %v118_v50  ;;  %v123_v11 = vrot.slane %v106_v54, %v122_v57 }
  0x30   :  { %v399_v13 = vrot.slane %v379_v59, %v118_v50  ;;  %v407_v14 = vrot.slane %v387_v60, %v118_v50  ;;  %v403_v18 = vrot.slane %v383_v63, %v118_v50  ;;  %v411_v19 = vrot.slane %v391_v0, %v118_v50 }
  0x31   :  { %512 = vmatpush1.bf16.msra.mxu0 %v511_v27  ;;  %561 = vset.pattern.permute.xlu0 %v655_v2  ;;  %v114_v2 = vsub.s32 1, %v109_v40 }
  0x32   :  { %544 = vmatpush1.bf16.msra.mxu1 %v543_v28  ;;  %514 = vmatprep.subr.bf16.mxu0 %v513_v29 }
  0x33   :  { %546 = vmatprep.subr.bf16.mxu1 %v545_v32  ;;  %v331_v53 = vrot.slane %v271_v42, %v114_v2  ;;  %v339_v56 = vrot.slane %v272_v43, %v114_v2  ;;  %v115_v7 = vrot.slane %v106_v54, %v114_v2  ;;  %v355_v8 = vrot.slane %v335_v55, %v114_v2 }
  0x34   :  { %v363_v12 = vrot.slane %v343_v58, %v114_v2 }
  0x35   :  { %516 = vmatpush1.bf16.msra.mxu0 %v515_v36  ;;  %v351_v5 = vrot.slane %v331_v53, %v114_v2  ;;  %v359_v9 = vrot.slane %v339_v56, %v114_v2 }
  0x36   :  { %548 = vmatpush1.bf16.msra.mxu1 %v547_v37 }
  0x38   :  { %193 = vmatmul.mubr.f32.vlgmr.msra.gmra.mrb[0].mxu0 %v41_v38 }
  0x39   :  { %264 = vmatmul.mubr.f32.vlgmr.msra.gmra.mrb[0].mxu1 %v41_v38 }
  0xa7   :  { %v276_v46 = vpop.permute.xlu0 %275  ;;  %v374_v20 = vpop.permute.xlu1 %373 }
  0xa8   :  { %v316_v16 = vmul.f32 %v303_v61, %v276_v46  ;;  %v318_v17 = vmul.f32 %v311_v62, %v276_v46  ;;  %v317_v24 = vmul.f32 %v307_v3, %v276_v46  ;;  %v319_v25 = vmul.f32 %v315_v4, %v276_v46  ;;  %v444_v61 = vld [vmem:[%s756_s1] sm:$0xff] }
  0xa9   :  { %v412_v35 = vmul.f32 %v399_v13, %v374_v20  ;;  %v413_v38 = vmul.f32 %v403_v18, %v374_v20  ;;  %v414_v39 = vmul.f32 %v407_v14, %v374_v20  ;;  %v415_v42 = vmul.f32 %v411_v19, %v374_v20 }
  0xac   :  { %v326_v10 = vpop.permute.xlu0 %325 }
  0xad   :  { %v364_v26 = vmul.f32 %v351_v5, %v326_v10  ;;  %v365_v30 = vmul.f32 %v355_v8, %v326_v10  ;;  %v366_v31 = vmul.f32 %v359_v9, %v326_v10  ;;  %v367_v34 = vmul.f32 %v363_v12, %v326_v10 }
 0x10b   :  { %v194_v15 = vpop.f32.mrb[0].mxu0 }
 0x10c   :  { %v195_v21 = vadd.f32 %v194_v15, %v111_v1  ;;  %v265_v22 = vpop.f32.mrb[0].mxu1  ;;  %v196_v23 = vpop.f32.mrb[1].mxu0 }
 0x10d   :  { %v266_v27 = vadd.f32 %v265_v22, %v119_v6  ;;  %v197_v28 = vadd.f32 %v196_v23, %v115_v7  ;;  %v267_v29 = vpop.f32.mrb[1].mxu1 }
 0x10e   :  { %v320_v32 = vadd.f32 %v316_v16, %v195_v21  ;;  %v268_v33 = vadd.f32 %v267_v29, %v123_v11 }
 0x10f   :  { %v322_v36 = vadd.f32 %v318_v17, %v266_v27  ;;  %v321_v37 = vadd.f32 %v317_v24, %v197_v28 }
 0x110   :  { %v323_v40 = vadd.f32 %v319_v25, %v268_v33  ;;  %v368_v41 = vadd.f32 %v364_v26, %v320_v32 }
 0x111   :  { %v369_v43 = vadd.f32 %v365_v30, %v321_v37  ;;  %v370_v2 = vadd.f32 %v366_v31, %v322_v36 }
 0x112   :  { %v371_v44 = vadd.f32 %v367_v34, %v323_v40  ;;  %v416_v45 = vadd.f32 %v412_v35, %v368_v41 }
 0x113   :  { %v417_v46 = vadd.f32 %v413_v38, %v369_v43  ;;  %v418_v47 = vadd.f32 %v414_v39, %v370_v2 }
 0x114   :  { %v419_v48 = vadd.f32 %v415_v42, %v371_v44  ;;  %v481_v49 = vmul.f32 -1.442695, %v416_v45 }
 0x115   :  { %v482_v50 = vmul.f32 -1.442695, %v417_v46  ;;  %v483_v52 = vmul.f32 -1.442695, %v418_v47 }
 0x116   :  { %562 = vpow2.f32 %v481_v49  ;;  %v484_v51 = vmul.f32 -1.442695, %v419_v48 }
 0x117   :  { %564 = vpow2.f32 %v482_v50 }
 0x118   :  { %566 = vpow2.f32 %v484_v51 }
 0x119   :  { %568 = vpow2.f32 %v483_v52 }
 0x120   :  { %v563_v53 = vpop.eup %562 }
 0x121   :  { %v565_v54 = vpop.eup %564  ;;  %v432_v55 = vadd.f32 1.0, %v563_v53 }
 0x122   :  { %v433_v56 = vadd.f32 1.0, %v565_v54  ;;  %v567_v57 = vpop.eup %566 }
 0x123   :  { %570 = vrcp.f32 %v432_v55  ;;  %v435_v58 = vadd.f32 1.0, %v567_v57  ;;  %v569_v59 = vpop.eup %568 }
 0x124   :  { %572 = vrcp.f32 %v433_v56  ;;  %v434_v60 = vadd.f32 1.0, %v569_v59 }
 0x125   :  { %574 = vrcp.f32 %v435_v58 }
 0x126   :  { %576 = vrcp.f32 %v434_v60 }
 0x12d   :  { %v571_v62 = vpop.eup %570 }
 0x12e   :  { %v573_v63 = vpop.eup %572  ;;  %v445_v0 = vmul.f32 %v571_v62, %v444_v61 }
 0x12f   :  { %v575_v1 = vpop.eup %574 }
 0x130   :  { %v446_v3 = vmul.f32 %v575_v1, %v573_v63  ;;  %v577_v6 = vpop.eup %576 }
 0x132   :  { %v447_v4 = vsub.f32 %v445_v0, %v446_v3 }
 0x134   :  { %450 = vst [vmem:[#allocation5] sm:$0xff] %v447_v4  ;;  %v448_v5 = vmax.f32 %v447_v4, 0.0 }
 0x135   :  { %611 = shalt.err (!%p608_p12)
}
 0x136   :  { %s612_s28 = scalar_lea.hbm %s761_s6, 128 }
 0x137   :  { %p613_p13 = scmp.ne.s32.totalorder %s761_s6, %s612_s28  ;;  %p616_p0 = scmp.lt.u32.totalorder %s612_s28, %s761_s6 }
 0x139   :  { %p618_p1 = pnand %p616_p0, %p613_p13 }
 0x13b   :  { %621 = shalt.err (!%p618_p1)
}
 0x13c   :  { %461 = dma.vmem_to_hbm [thread:$0]  %s459_s23, 128, %s761_s6, [#allocation4]   ;;  %v449_v7 = vmul.f32 %v577_v6, %v448_v5 }
 0x13d   :  { %s622_s12 = scalar_lea.vmem %s469_s25, 128  ;;  %p627_p3 = scmp.lt.s32.totalorder %s469_s25, %s469_s25 }
 0x13e   :  { %451 = vst [vmem:[#allocation6] sm:$0xff] %v449_v7  ;;  %p623_p2 = scmp.ne.s32.totalorder %s469_s25, %s622_s12  ;;  %p628_p4 = scmp.lt.s32.totalorder %s622_s12, %s622_s12 }
 0x140   :  { %p629_p5 = por %p628_p4, %p627_p3 }
 0x142   :  { %p630_p6 = pnand %p629_p5, %p623_p2 }
 0x144   :  { %633 = shalt.err (!%p630_p6)
}
 0x145   :  { %s634_s4 = scalar_lea.hbm %s762_s7, 128 }
 0x146   :  { %p635_p7 = scmp.ne.s32.totalorder %s762_s7, %s634_s4  ;;  %p638_p8 = scmp.lt.u32.totalorder %s634_s4, %s762_s7 }
 0x148   :  { %p640_p9 = pnand %p638_p8, %p635_p7 }
 0x14a   :  { %643 = shalt.err (!%p640_p9)
}
 0x14b   :  { %471 = dma.vmem_to_hbm [thread:$0]  %s469_s25, 128, %s762_s7, [#allocation7]  }
 0x14c   :  { %646 = dma.done.wait [#allocation4], 128  }
 0x14d   :  { %647 = vsyncadd [#allocation4], 4294967168 }
 0x14e   :  { %648 = dma.done.wait [#allocation7], 128  }
 0x14f   :  { %649 = vsyncadd [#allocation7], 4294967168 }
 0x150   :  { %478 = vsyncpa [#allocation3], 1 }
 0x151   :  { %479 = vsyncpa [#allocation4], 1 }
 0x152   :  { %480 = vsyncpa [#allocation7], 1 }

</bundles_post_ra>
